<compile_context>
chip_gen: v7x
topology: tpu7x:2x2x1
jax: 0.10.0
libtpu: 0.0.40
codegen_flags: <defaults>
</compile_context>

<pallas_src>
import functools

import jax
import jax.numpy as jnp
from jax.experimental import pallas as pl
from jax.experimental.pallas import tpu as pltpu

_LANES = 512        # lane-dense last dim (multiple of 128 -> unmasked stores)
_TILE_ROWS = 256    # (256, 512) f32 tile = 0.5 MiB per input buffer


def _reduce_kernel(p_ref, g_ref, m_ref, psum_ref,
                   a_pgm, a_pm, a_gm, a_m,
                   *, rows_all, tile_rows, tiles_per_split, needs_mask):
    i = pl.program_id(1)  # inner, "arbitrary" (reduction) axis

    @pl.when(i == 0)
    def _init():
        a_pgm[...] = jnp.zeros_like(a_pgm)
        a_pm[...] = jnp.zeros_like(a_pm)
        a_gm[...] = jnp.zeros_like(a_gm)
        a_m[...] = jnp.zeros_like(a_m)

    p = p_ref[...].astype(jnp.float32)
    g = g_ref[...].astype(jnp.float32)
    m = m_ref[...].astype(jnp.float32)

    if needs_mask:
        # Zero out rows past the logical end of the flattened input.  Every
        # accumulated term carries a factor of `m`, so masking `m` suffices.
        c = pl.program_id(0)
        t = c * tiles_per_split + i                 # logical tile index
        valid = rows_all - t * tile_rows            # rows still in-bounds
        row = jax.lax.broadcasted_iota(jnp.int32, m.shape, 0)
        m = jnp.where(row < valid, m, 0.0)

    gm = g * m
    # Pure-VPU elementwise accumulation; no per-step cross-lane reductions.
    a_pgm[...] += p * gm     # sum(pred * gt * mask)   (dice intersection)
    a_pm[...] += p * m       # sum(pred * mask)
    a_gm[...] += gm          # sum(gt * mask)          == positive.sum()
    a_m[...] += m            # sum(mask)   (negative.sum() = m_sum - gm_sum)

    @pl.when(i == pl.num_programs(1) - 1)
    def _finalize():
        s0 = jnp.sum(a_pgm[...])
        s1 = jnp.sum(a_pm[...])
        s2 = jnp.sum(a_gm[...])
        s3 = jnp.sum(a_m[...])
        row8 = jax.lax.broadcasted_iota(jnp.int32, (8, 128), 0)
        packed = jnp.where(row8 == 0, s0,
                 jnp.where(row8 == 1, s1,
                 jnp.where(row8 == 2, s2,
                 jnp.where(row8 == 3, s3, 0.0))))
        psum_ref[...] = packed[None].astype(jnp.float32)


def _run_reduction(pred, gt, mask):
    """Returns [sum(p*g*m), sum(p*m), sum(g*m), sum(m)] as a (4,) f32 array."""
    n = pred.size                       # static under jit
    p_flat = pred.reshape(-1)
    g_flat = gt.reshape(-1)
    m_flat = mask.reshape(-1)

    rows_all = n // _LANES
    main = rows_all * _LANES
    tail = n - main

    sums = jnp.zeros((4,), jnp.float32)

    if rows_all > 0:
        # Free (bitcast) reshape when n % 512 == 0; otherwise a prefix slice.
        p2 = p_flat[:main].reshape(rows_all, _LANES)
        g2 = g_flat[:main].reshape(rows_all, _LANES)
        m2 = m_flat[:main].reshape(rows_all, _LANES)

        tile_rows = _TILE_ROWS if rows_all >= _TILE_ROWS else rows_all
        tiles = -(-rows_all // tile_rows)
        num_splits = 2 if tiles >= 2 else 1          # 2-TC streaming on v7x
        tps = -(-tiles // num_splits)
        needs_mask = (rows_all % tile_rows != 0) or (num_splits * tps != tiles)

        def in_map(c, i):
            t = c * tps + i
            # Clamp so no block origin ever lies fully outside the array
            # (duplicated tiles are zeroed by the in-kernel row mask).
            return (jnp.minimum(t, tiles - 1), 0)

        kernel = functools.partial(
            _reduce_kernel, rows_all=rows_all, tile_rows=tile_rows,
            tiles_per_split=tps, needs_mask=needs_mask)

        psums = pl.pallas_call(
            kernel,
            out_shape=jax.ShapeDtypeStruct((num_splits, 8, 128), jnp.float32),
            grid_spec=pltpu.PrefetchScalarGridSpec(
                num_scalar_prefetch=0,
                grid=(num_splits, tps),
                in_specs=[pl.BlockSpec((tile_rows, _LANES), in_map)
                          for _ in range(3)],
                out_specs=pl.BlockSpec((1, 8, 128), lambda c, i: (c, 0, 0)),
                scratch_shapes=[pltpu.VMEM((tile_rows, _LANES), jnp.float32)
                                for _ in range(4)],
            ),
            compiler_params=pltpu.CompilerParams(
                dimension_semantics=("parallel", "arbitrary")),
        )(p2, g2, m2)

        sums = sums + jnp.sum(psums[:, :4, 0], axis=0)

    if tail > 0:
        # < 512-element lane tail: negligible, reduced with plain jnp.
        pt = p_flat[main:].astype(jnp.float32)
        gtl = g_flat[main:].astype(jnp.float32)
        mt = m_flat[main:].astype(jnp.float32)
        gm_t = gtl * mt
        sums = sums + jnp.stack([jnp.sum(pt * gm_t), jnp.sum(pt * mt),
                                 jnp.sum(gm_t), jnp.sum(mt)])

    return sums


def _balance_loss_impl(pred, gt, mask, negative_ratio, eps, balance,
                       return_origin):
    assert pred.shape == gt.shape
    assert pred.shape == mask.shape

    sums = _run_reduction(pred, gt, mask)
    intersection = sums[0]            # sum(pred * gt * mask)
    pred_mask_sum = sums[1]           # sum(pred * mask)
    gt_mask_sum = sums[2]             # sum(gt * mask)  == positive.sum()
    mask_sum = sums[3]                # sum(mask)
    neg_sum = mask_sum - gt_mask_sum  # sum((1 - gt) * mask) == negative.sum()

    # DiceLoss (scalar).  (PyTorch's host-side `assert loss <= 1` dropped to
    # stay fully traced.)
    union = pred_mask_sum + gt_mask_sum + eps
    dice = 1.0 - 2.0 * intersection / union

    if not balance:
        return dice

    # int(...) truncation of the non-negative float sums, kept traced and in
    # the same order as the PyTorch reference.
    positive_count = jnp.floor(gt_mask_sum)
    negative_count = jnp.floor(
        jnp.minimum(neg_sum, positive_count * negative_ratio))

    positive_loss_sum = gt_mask_sum * dice   # sum(positive * loss)

    # Hard-negative mining, closed form: loss is a scalar (>= 0 for valid
    # prob/binary inputs) and negative is {0,1}, so the descending-sort top-k
    # sum is exactly negative_count * loss.  No O(n log n) sort needed.
    # TODO(synk): only exact for binary gt/mask; soft labels would need the sort.
    neg_topk_sum = negative_count * dice

    balanced = jnp.where(
        negative_count > 0,
        (positive_loss_sum + neg_topk_sum)
        / (positive_count + negative_count + eps),
        positive_loss_sum / (positive_count + eps),
    )

    if return_origin:
        return balanced, dice
    return balanced


_balance_loss_jit = jax.jit(_balance_loss_impl, static_argnums=(3, 4, 5, 6))


def balance_loss(pred, gt, mask, *, negative_ratio=3, eps=1e-6,
                 balance=True, return_origin=False):
    """Replicates BalanceLoss.forward with main_loss_type='DiceLoss'."""
    return _balance_loss_jit(pred, gt, mask, negative_ratio, eps, balance,
                             return_origin)


def _reference_balance_loss(pred, gt, mask, negative_ratio=3, eps=1e-6):
    """Plain-jnp transcription of the PyTorch module (incl. the sort)."""
    positive = gt * mask
    negative = (1.0 - gt) * mask
    positive_count = jnp.floor(positive.sum())
    negative_count = jnp.floor(
        jnp.minimum(negative.sum(), positive_count * negative_ratio))
    inter = jnp.sum(pred * gt * mask)
    union = jnp.sum(pred * mask) + jnp.sum(gt * mask) + eps
    loss = 1.0 - 2.0 * inter / union
    positive_loss = positive * loss
    neg_sorted = -jnp.sort(-(negative * loss).reshape(-1))   # descending
    ranks = jnp.arange(neg_sorted.shape[0], dtype=jnp.int32)
    neg_top = jnp.sum(jnp.where(ranks < negative_count, neg_sorted, 0.0))
    return jnp.where(
        negative_count > 0,
        (positive_loss.sum() + neg_top)
        / (positive_count + negative_count + eps),
        positive_loss.sum() / (positive_count + eps))


if __name__ == "__main__":
    key = jax.random.PRNGKey(0)
    k1, k2, k3 = jax.random.split(key, 3)

    B, C, H, W = 2, 4, 16, 16            # NCHW, matches the DBNet-style maps
    pred = jax.random.uniform(k1, (B, C, H, W), dtype=jnp.float32)          # probs
    gt = jax.random.bernoulli(k2, 0.3, (B, C, H, W)).astype(jnp.float32)    # binary
    mask = jax.random.bernoulli(k3, 0.9, (B, C, H, W)).astype(jnp.float32)  # binary

    out = balance_loss(pred, gt, mask)
    out = jax.block_until_ready(out)

    ref = _reference_balance_loss(pred, gt, mask)
    assert jnp.isfinite(out)
    assert jnp.allclose(out, ref, rtol=1e-3, atol=1e-3), (out, ref)
    print("KERNEL_OK")
</pallas_src>

<mosaic_0001>
module attributes {stable_mosaic.version = 11 : i64} {
  func.func @_reduce_kernel(%arg0: i32, %arg1: i32, %arg2: memref<4x512xf32, #tpu.memory_space<vmem>>, %arg3: memref<4x512xf32, #tpu.memory_space<vmem>>, %arg4: memref<4x512xf32, #tpu.memory_space<vmem>>, %arg5: memref<1x8x128xf32, #tpu.memory_space<vmem>>, %arg6: memref<4x512xf32, #tpu.memory_space<vmem>>, %arg7: memref<4x512xf32, #tpu.memory_space<vmem>>, %arg8: memref<4x512xf32, #tpu.memory_space<vmem>>, %arg9: memref<4x512xf32, #tpu.memory_space<vmem>>) attributes {dimension_semantics = [#tpu.dimension_semantics<parallel>, #tpu.dimension_semantics<arbitrary>], iteration_bounds = array<i64: 1, 1>, scalar_prefetch = 0 : i64, scratch_operands = 4 : i64, tpu.core_type = #tpu.core_type<tc>, window_params = [{transform_indices = @transform_0, window_bounds = array<i64: 4, 512>}, {transform_indices = @transform_1, window_bounds = array<i64: 4, 512>}, {transform_indices = @transform_2, window_bounds = array<i64: 4, 512>}, {transform_indices = @transform_3, window_bounds = array<i64: 1, 8, 128>}]} {
    %c0_i32 = arith.constant 0 : i32
    %0 = arith.cmpi eq, %arg1, %c0_i32 : i32
    %1 = arith.extui %0 : i1 to i32
    %c0_i32_0 = arith.constant 0 : i32
    %2 = arith.cmpi ne, %1, %c0_i32_0 : i32
    scf.if %2 {
      %cst = arith.constant 0.000000e+00 : f32
      %24 = vector.broadcast %cst : f32 to vector<4x512xf32>
      %c0_24 = arith.constant 0 : index
      %c0_25 = arith.constant 0 : index
      %25 = vector.load %arg6[%c0_24, %c0_25] : memref<4x512xf32, #tpu.memory_space<vmem>>, vector<4x512xf32>
      tpu.vector_store %arg6[%c0_24, %c0_25], %24 {strides = array<i32>} : memref<4x512xf32, #tpu.memory_space<vmem>>, vector<4x512xf32>,
      %cst_26 = arith.constant 0.000000e+00 : f32
      %26 = vector.broadcast %cst_26 : f32 to vector<4x512xf32>
      %c0_27 = arith.constant 0 : index
      %c0_28 = arith.constant 0 : index
      %27 = vector.load %arg7[%c0_27, %c0_28] : memref<4x512xf32, #tpu.memory_space<vmem>>, vector<4x512xf32>
      tpu.vector_store %arg7[%c0_27, %c0_28], %26 {strides = array<i32>} : memref<4x512xf32, #tpu.memory_space<vmem>>, vector<4x512xf32>,
      %cst_29 = arith.constant 0.000000e+00 : f32
      %28 = vector.broadcast %cst_29 : f32 to vector<4x512xf32>
      %c0_30 = arith.constant 0 : index
      %c0_31 = arith.constant 0 : index
      %29 = vector.load %arg8[%c0_30, %c0_31] : memref<4x512xf32, #tpu.memory_space<vmem>>, vector<4x512xf32>
      tpu.vector_store %arg8[%c0_30, %c0_31], %28 {strides = array<i32>} : memref<4x512xf32, #tpu.memory_space<vmem>>, vector<4x512xf32>,
      %cst_32 = arith.constant 0.000000e+00 : f32
      %30 = vector.broadcast %cst_32 : f32 to vector<4x512xf32>
      %c0_33 = arith.constant 0 : index
      %c0_34 = arith.constant 0 : index
      %31 = vector.load %arg9[%c0_33, %c0_34] : memref<4x512xf32, #tpu.memory_space<vmem>>, vector<4x512xf32>
      tpu.vector_store %arg9[%c0_33, %c0_34], %30 {strides = array<i32>} : memref<4x512xf32, #tpu.memory_space<vmem>>, vector<4x512xf32>,
    } else {
    }
    %c0 = arith.constant 0 : index
    %c0_1 = arith.constant 0 : index
    %3 = vector.load %arg2[%c0, %c0_1] : memref<4x512xf32, #tpu.memory_space<vmem>>, vector<4x512xf32>
    %c0_2 = arith.constant 0 : index
    %c0_3 = arith.constant 0 : index
    %4 = vector.load %arg3[%c0_2, %c0_3] : memref<4x512xf32, #tpu.memory_space<vmem>>, vector<4x512xf32>
    %c0_4 = arith.constant 0 : index
    %c0_5 = arith.constant 0 : index
    %5 = vector.load %arg4[%c0_4, %c0_5] : memref<4x512xf32, #tpu.memory_space<vmem>>, vector<4x512xf32>
    %6 = arith.mulf %4, %5 : vector<4x512xf32>
    %c0_6 = arith.constant 0 : index
    %c0_7 = arith.constant 0 : index
    %7 = vector.load %arg6[%c0_6, %c0_7] : memref<4x512xf32, #tpu.memory_space<vmem>>, vector<4x512xf32>
    %8 = arith.mulf %3, %6 : vector<4x512xf32>
    %9 = arith.addf %7, %8 : vector<4x512xf32>
    %c0_8 = arith.constant 0 : index
    %c0_9 = arith.constant 0 : index
    %10 = vector.load %arg6[%c0_8, %c0_9] : memref<4x512xf32, #tpu.memory_space<vmem>>, vector<4x512xf32>
    tpu.vector_store %arg6[%c0_8, %c0_9], %9 {strides = array<i32>} : memref<4x512xf32, #tpu.memory_space<vmem>>, vector<4x512xf32>,
    %c0_10 = arith.constant 0 : index
    %c0_11 = arith.constant 0 : index
    %11 = vector.load %arg7[%c0_10, %c0_11] : memref<4x512xf32, #tpu.memory_space<vmem>>, vector<4x512xf32>
    %12 = arith.mulf %3, %5 : vector<4x512xf32>
    %13 = arith.addf %11, %12 : vector<4x512xf32>
    %c0_12 = arith.constant 0 : index
    %c0_13 = arith.constant 0 : index
    %14 = vector.load %arg7[%c0_12, %c0_13] : memref<4x512xf32, #tpu.memory_space<vmem>>, vector<4x512xf32>
    tpu.vector_store %arg7[%c0_12, %c0_13], %13 {strides = array<i32>} : memref<4x512xf32, #tpu.memory_space<vmem>>, vector<4x512xf32>,
    %c0_14 = arith.constant 0 : index
    %c0_15 = arith.constant 0 : index
    %15 = vector.load %arg8[%c0_14, %c0_15] : memref<4x512xf32, #tpu.memory_space<vmem>>, vector<4x512xf32>
    %16 = arith.addf %15, %6 : vector<4x512xf32>
    %c0_16 = arith.constant 0 : index
    %c0_17 = arith.constant 0 : index
    %17 = vector.load %arg8[%c0_16, %c0_17] : memref<4x512xf32, #tpu.memory_space<vmem>>, vector<4x512xf32>
    tpu.vector_store %arg8[%c0_16, %c0_17], %16 {strides = array<i32>} : memref<4x512xf32, #tpu.memory_space<vmem>>, vector<4x512xf32>,
    %c0_18 = arith.constant 0 : index
    %c0_19 = arith.constant 0 : index
    %18 = vector.load %arg9[%c0_18, %c0_19] : memref<4x512xf32, #tpu.memory_space<vmem>>, vector<4x512xf32>
    %19 = arith.addf %18, %5 : vector<4x512xf32>
    %c0_20 = arith.constant 0 : index
    %c0_21 = arith.constant 0 : index
    %20 = vector.load %arg9[%c0_20, %c0_21] : memref<4x512xf32, #tpu.memory_space<vmem>>, vector<4x512xf32>
    tpu.vector_store %arg9[%c0_20, %c0_21], %19 {strides = array<i32>} : memref<4x512xf32, #tpu.memory_space<vmem>>, vector<4x512xf32>,
    %c0_i32_22 = arith.constant 0 : i32
    %21 = arith.cmpi eq, %arg1, %c0_i32_22 : i32
    %22 = arith.extui %21 : i1 to i32
    %c0_i32_23 = arith.constant 0 : i32
    %23 = arith.cmpi ne, %22, %c0_i32_23 : i32
    scf.if %23 {
      %c0_24 = arith.constant 0 : index
      %c0_25 = arith.constant 0 : index
      %24 = vector.load %arg6[%c0_24, %c0_25] : memref<4x512xf32, #tpu.memory_space<vmem>>, vector<4x512xf32>
      %25 = vector.shape_cast %24 : vector<4x512xf32> to vector<1x4x512xf32>
      %cst = arith.constant dense<0.000000e+00> : vector<1xf32>
      %26 = vector.multi_reduction <add>, %25, %cst [1, 2] : vector<1x4x512xf32> to vector<1xf32>
      %27 = vector.shape_cast %26 : vector<1xf32> to vector<1x1x1xf32>
      %28 = vector.extract %27[0, 0, 0] : f32 from vector<1x1x1xf32>
      %c0_26 = arith.constant 0 : index
      %c0_27 = arith.constant 0 : index
      %29 = vector.load %arg7[%c0_26, %c0_27] : memref<4x512xf32, #tpu.memory_space<vmem>>, vector<4x512xf32>
      %30 = vector.shape_cast %29 : vector<4x512xf32> to vector<1x4x512xf32>
      %cst_28 = arith.constant dense<0.000000e+00> : vector<1xf32>
      %31 = vector.multi_reduction <add>, %30, %cst_28 [1, 2] : vector<1x4x512xf32> to vector<1xf32>
      %32 = vector.shape_cast %31 : vector<1xf32> to vector<1x1x1xf32>
      %33 = vector.extract %32[0, 0, 0] : f32 from vector<1x1x1xf32>
      %c0_29 = arith.constant 0 : index
      %c0_30 = arith.constant 0 : index
      %34 = vector.load %arg8[%c0_29, %c0_30] : memref<4x512xf32, #tpu.memory_space<vmem>>, vector<4x512xf32>
      %35 = vector.shape_cast %34 : vector<4x512xf32> to vector<1x4x512xf32>
      %cst_31 = arith.constant dense<0.000000e+00> : vector<1xf32>
      %36 = vector.multi_reduction <add>, %35, %cst_31 [1, 2] : vector<1x4x512xf32> to vector<1xf32>
      %37 = vector.shape_cast %36 : vector<1xf32> to vector<1x1x1xf32>
      %38 = vector.extract %37[0, 0, 0] : f32 from vector<1x1x1xf32>
      %c0_32 = arith.constant 0 : index
      %c0_33 = arith.constant 0 : index
      %39 = vector.load %arg9[%c0_32, %c0_33] : memref<4x512xf32, #tpu.memory_space<vmem>>, vector<4x512xf32>
      %40 = vector.shape_cast %39 : vector<4x512xf32> to vector<1x4x512xf32>
      %cst_34 = arith.constant dense<0.000000e+00> : vector<1xf32>
      %41 = vector.multi_reduction <add>, %40, %cst_34 [1, 2] : vector<1x4x512xf32> to vector<1xf32>
      %42 = vector.shape_cast %41 : vector<1xf32> to vector<1x1x1xf32>
      %43 = vector.extract %42[0, 0, 0] : f32 from vector<1x1x1xf32>
      %44 = tpu.iota {dimensions = array<i32: 0>} : vector<8x128xi32>
      %c0_i32_35 = arith.constant 0 : i32
      %45 = vector.broadcast %c0_i32_35 : i32 to vector<8x128xi32>
      %46 = arith.cmpi eq, %44, %45 : vector<8x128xi32>
      %c1_i32 = arith.constant 1 : i32
      %47 = vector.broadcast %c1_i32 : i32 to vector<8x128xi32>
      %48 = arith.cmpi eq, %44, %47 : vector<8x128xi32>
      %c2_i32 = arith.constant 2 : i32
      %49 = vector.broadcast %c2_i32 : i32 to vector<8x128xi32>
      %50 = arith.cmpi eq, %44, %49 : vector<8x128xi32>
      %c3_i32 = arith.constant 3 : i32
      %51 = vector.broadcast %c3_i32 : i32 to vector<8x128xi32>
      %52 = arith.cmpi eq, %44, %51 : vector<8x128xi32>
      %cst_36 = arith.constant 0.000000e+00 : f32
      %53 = vector.broadcast %43 : f32 to vector<8x128xf32>
      %54 = vector.broadcast %cst_36 : f32 to vector<8x128xf32>
      %55 = arith.select %52, %53, %54 : vector<8x128xi1>, vector<8x128xf32>
      %56 = vector.broadcast %38 : f32 to vector<8x128xf32>
      %57 = arith.select %50, %56, %55 : vector<8x128xi1>, vector<8x128xf32>
      %58 = vector.broadcast %33 : f32 to vector<8x128xf32>
      %59 = arith.select %48, %58, %57 : vector<8x128xi1>, vector<8x128xf32>
      %60 = vector.broadcast %28 : f32 to vector<8x128xf32>
      %61 = arith.select %46, %60, %59 : vector<8x128xi1>, vector<8x128xf32>
      %62 = vector.shape_cast %61 : vector<8x128xf32> to vector<1x8x128xf32>
      %c0_37 = arith.constant 0 : index
      %c0_38 = arith.constant 0 : index
      %c0_39 = arith.constant 0 : index
      %63 = vector.load %arg5[%c0_37, %c0_38, %c0_39] : memref<1x8x128xf32, #tpu.memory_space<vmem>>, vector<1x8x128xf32>
      tpu.vector_store %arg5[%c0_37, %c0_38, %c0_39], %62 {strides = array<i32>} : memref<1x8x128xf32, #tpu.memory_space<vmem>>, vector<1x8x128xf32>,
    } else {
    }
    return
  }
  func.func @transform_0(%arg0: i32, %arg1: i32) -> (i32, i32) {
    %c1_i32 = arith.constant 1 : i32
    %0 = arith.muli %arg0, %c1_i32 : i32
    %1 = arith.addi %0, %arg1 : i32
    %c0_i32 = arith.constant 0 : i32
    %2 = arith.minsi %1, %c0_i32 : i32
    %c0_i32_0 = arith.constant 0 : i32
    %c0_i32_1 = arith.constant 0 : i32
    return %2, %c0_i32_0 : i32, i32
  }
  func.func @transform_1(%arg0: i32, %arg1: i32) -> (i32, i32) {
    %c1_i32 = arith.constant 1 : i32
    %0 = arith.muli %arg0, %c1_i32 : i32
    %1 = arith.addi %0, %arg1 : i32
    %c0_i32 = arith.constant 0 : i32
    %2 = arith.minsi %1, %c0_i32 : i32
    %c0_i32_0 = arith.constant 0 : i32
    %c0_i32_1 = arith.constant 0 : i32
    return %2, %c0_i32_0 : i32, i32
  }
  func.func @transform_2(%arg0: i32, %arg1: i32) -> (i32, i32) {
    %c1_i32 = arith.constant 1 : i32
    %0 = arith.muli %arg0, %c1_i32 : i32
    %1 = arith.addi %0, %arg1 : i32
    %c0_i32 = arith.constant 0 : i32
    %2 = arith.minsi %1, %c0_i32 : i32
    %c0_i32_0 = arith.constant 0 : i32
    %c0_i32_1 = arith.constant 0 : i32
    return %2, %c0_i32_0 : i32, i32
  }
  func.func @transform_3(%arg0: i32, %arg1: i32) -> (i32, i32, i32) {
    %c0_i32 = arith.constant 0 : i32
    %c0_i32_0 = arith.constant 0 : i32
    %c0_i32_1 = arith.constant 0 : i32
    return %arg0, %c0_i32, %c0_i32_0 : i32, i32, i32
  }
}

</mosaic_0001>

<bundles_post_ra>
// kernel: _balance_loss_impl.1
= control target key start
LH: loop header
LB: loop body
LE: loop exit
PB: predicated region body
PF: predicated region fallthrough
CT: control target
= control target key end

     0   :  { %vm163_vm0 = vcmask 1043456   ;;  %s356_s1 = inlined_call_operand.vmem [shape: f32[4,512], index: 1, kind: input, shape index: {}]   ;;  %s357_s2 = inlined_call_operand.vmem [shape: f32[4,512], index: 2, kind: input, shape index: {}]   ;;  %s358_s0 = inlined_call_operand.vmem [shape: f32[4,512], index: 0, kind: input, shape index: {}]   ;;  %s359_s3 = inlined_call_operand.vmem [shape: f32[1,8,128], index: 3, kind: output, shape index: {}]  }
   0x1   :  { %v118_v0 = vld [vmem:[%s356_s1] sm:$0xff]  ;;  %v119_v1 = vld [vmem:[%s356_s1 + $0x8] sm:$0xff] }
   0x2   :  { %v120_v2 = vld [vmem:[%s357_s2] sm:$0xff]  ;;  %v121_v3 = vld [vmem:[%s357_s2 + $0x8] sm:$0xff] }
   0x3   :  { %v122_v4 = vmul.f32 %v120_v2, %v118_v0  ;;  %v116_v5 = vld [vmem:[%s358_s0] sm:$0xff]  ;;  %v117_v6 = vld [vmem:[%s358_s0 + $0x8] sm:$0xff]  ;;  %v232_v7 = vcombine.high %v120_v2, %v120_v2  ;;  %v236_v8 = vsel %vm163_vm0, %v120_v2, 0.0  ;;  %v123_v9 = vmul.f32 %v121_v3, %v119_v1 }
   0x4   :  { %v233_v10 = vcombine.high %v121_v3, %v121_v3  ;;  %v134_v11 = vmul.f32 %v120_v2, %v116_v5  ;;  %v239_v19 = vsel %vm163_vm0, %v121_v3, 0.0  ;;  %v135_v30 = vmul.f32 %v121_v3, %v117_v6 }
   0x5   :  { %v208_v12 = vcombine.high %v122_v4, %v122_v4  ;;  %v212_v13 = vsel %vm163_vm0, %v122_v4, 0.0  ;;  %v126_v14 = vmul.f32 %v122_v4, %v116_v5  ;;  %v237_v15 = vsel %vm163_vm0, %v232_v7, 0.0 }
   0x6   :  { %v209_v16 = vcombine.high %v123_v9, %v123_v9  ;;  %v127_v17 = vmul.f32 %v123_v9, %v117_v6  ;;  %v238_v18 = vadd.f32 %v237_v15, %v236_v8  ;;  %v215_v21 = vsel %vm163_vm0, %v123_v9, 0.0 }
   0x7   :  { %v213_v20 = vsel %vm163_vm0, %v208_v12, 0.0  ;;  %v159_v22 = vcombine.high %v126_v14, %v126_v14  ;;  %v164_v23 = vsel %vm163_vm0, %v126_v14, 0.0  ;;  %v241_v27 = vsel %vm163_vm0, %v233_v10, 0.0 }
   0x8   :  { %v214_v24 = vadd.f32 %v213_v20, %v212_v13  ;;  %v217_v25 = vsel %vm163_vm0, %v209_v16, 0.0  ;;  %v160_v26 = vcombine.high %v127_v17, %v127_v17  ;;  %v167_v29 = vsel %vm163_vm0, %v127_v17, 0.0 }
   0x9   :  { %v165_v28 = vsel %vm163_vm0, %v159_v22, 0.0  ;;  %v184_v31 = vcombine.high %v134_v11, %v134_v11  ;;  %v240_v34 = vadd.f32 %v239_v19, %v238_v18  ;;  %v188_v35 = vsel %vm163_vm0, %v134_v11, 0.0 }
   0xa   :  { %v216_v32 = vadd.f32 %v215_v21, %v214_v24  ;;  %v166_v33 = vadd.f32 %v165_v28, %v164_v23  ;;  %v169_v36 = vsel %vm163_vm0, %v160_v26, 0.0  ;;  %v185_v37 = vcombine.high %v135_v30, %v135_v30 }
   0xb   :  { %v189_v38 = vsel %vm163_vm0, %v184_v31, 0.0  ;;  %v191_v39 = vsel %vm163_vm0, %v135_v30, 0.0  ;;  %v242_v45 = vadd.f32 %v241_v27, %v240_v34  ;;  %v252_v12 = vlaneseq }
   0xc   :  { %v218_v40 = vadd.f32 %v217_v25, %v216_v32  ;;  %v168_v41 = vadd.f32 %v167_v29, %v166_v33  ;;  %v190_v42 = vadd.f32 %v189_v38, %v188_v35  ;;  %v193_v43 = vsel %vm163_vm0, %v185_v37, 0.0 }
   0xd   :  { %v253_v13 = vshrl.u32 %v252_v12, 7 }
   0xe   :  { %219 = vadd.xlane.f32.xlu1 %v218_v40  ;;  %v170_v44 = vadd.f32 %v169_v36, %v168_v41  ;;  %v192_v46 = vadd.f32 %v191_v39, %v190_v42 }
   0xf   :  { %vm257_vm1 = vcmp.eq.s32.totalorder %v253_v13, 3  ;;  %vm256_vm2 = vcmp.eq.s32.totalorder %v253_v13, 2  ;;  %vm255_vm3 = vcmp.eq.s32.totalorder %v253_v13, 1  ;;  %vm254_vm4 = vcmp.eq.s32.totalorder %v253_v13, 0 }
  0x10   :  { %171 = vadd.xlane.f32.xlu0 %v170_v44  ;;  %v194_v47 = vadd.f32 %v193_v43, %v192_v46 }
  0x12   :  { %243 = vadd.xlane.f32.xlu1 %v242_v45 }
  0x14   :  { %195 = vadd.xlane.f32.xlu0 %v194_v47 }
  0x9b   :  { %v220_v48 = vpop.xlane.xlu1 %219 }
  0x9c   :  { %v221_v49 = vrot.slane %v220_v48, 4 }
  0x9d   :  { %v172_v50 = vpop.xlane.xlu0 %171 }
  0x9e   :  { %v222_v51 = vadd.f32 %v221_v49, %v220_v48  ;;  %v173_v52 = vrot.slane %v172_v50, 4 }
  0x9f   :  { %v244_v53 = vpop.xlane.xlu1 %243 }
  0xa0   :  { %v174_v54 = vadd.f32 %v173_v52, %v172_v50  ;;  %v245_v55 = vrot.slane %v244_v53, 4  ;;  %v223_v56 = vrot.slane %v222_v51, 2 }
  0xa1   :  { %v196_v57 = vpop.xlane.xlu0 %195 }
  0xa2   :  { %v175_v58 = vrot.slane %v174_v54, 2  ;;  %v246_v59 = vadd.f32 %v245_v55, %v244_v53  ;;  %v197_v60 = vrot.slane %v196_v57, 4  ;;  %v224_v0 = vadd.f32 %v223_v56, %v222_v51 }
  0xa4   :  { %v247_v61 = vrot.slane %v246_v59, 2  ;;  %v198_v62 = vadd.f32 %v197_v60, %v196_v57  ;;  %v176_v63 = vadd.f32 %v175_v58, %v174_v54  ;;  %v225_v6 = vrot.slane %v224_v0, 1 }
  0xa6   :  { %v248_v1 = vadd.f32 %v247_v61, %v246_v59  ;;  %v199_v2 = vrot.slane %v198_v62, 2  ;;  %v177_v3 = vrot.slane %v176_v63, 1  ;;  %v226_v10 = vadd.f32 %v225_v6, %v224_v0 }
  0xa8   :  { %v200_v4 = vadd.f32 %v199_v2, %v198_v62  ;;  %v178_v5 = vadd.f32 %v177_v3, %v176_v63  ;;  %v249_v8 = vrot.slane %v248_v1, 1 }
  0xaa   :  { %289 = vpush %v178_v5  ;;  %v201_v7 = vrot.slane %v200_v4, 1  ;;  %v250_v11 = vadd.f32 %v249_v8, %v248_v1 }
  0xac   :  { %v202_v9 = vadd.f32 %v201_v7, %v200_v4 }
  0xae   :  { %291 = vpush %v202_v9 }
  0xaf   :  { %293 = vpush %v226_v10 }
  0xb0   :  { %295 = vpush %v250_v11 }
  0xdb   :  { %s290_s0 = spop %289 }
  0xdc   :  { %v264_v19 = vstv %s290_s0 }
  0xdf   :  { %s292_s1 = spop %291 }
  0xe0   :  { %s294_s2 = spop %293  ;;  %v262_v17 = vstv %s292_s1 }
  0xe1   :  { %v260_v14 = vstv %s294_s2  ;;  %s296_s24 = spop %295 }
  0xe2   :  { %v258_v15 = vstv %s296_s24 }
  0xe3   :  { %v259_v16 = vsel %vm257_vm1, %v258_v15, 0.0 }
  0xe4   :  { %v261_v18 = vsel %vm256_vm2, %v260_v14, %v259_v16 }
  0xe5   :  { %v263_v20 = vsel %vm255_vm3, %v262_v17, %v261_v18 }
  0xe6   :  { %v265_v21 = vsel %vm254_vm4, %v264_v19, %v263_v20 }
  0xe7   :  { %266 = vst [vmem:[%s359_s3] sm:$0xff] %v265_v21 }

</bundles_post_ra>
